<compile_context>
chip_gen: v7x
topology: tpu7x:2x2x1
jax: 0.10.0
libtpu: 0.0.40
codegen_flags: <defaults>
</compile_context>

<pallas_src>
import functools

import numpy as np
import jax
import jax.numpy as jnp
from jax.experimental import pallas as pl
from jax.experimental.pallas import tpu as pltpu


def _moe_conv_kernel(ord_ref, sexp_ref, y_ref, w_ref, out_ref, pt_ref, *,
                     Cin, H, W, K, pad, CKK, CKK_pad):
    # ord_ref/sexp_ref : SMEM scalar prefetch (consumed only by index_maps)
    # y_ref   : VMEM [1, Cin, HW + 2*(pad*W + pad)]  flattened input + zero halo
    # w_ref   : VMEM [1, EW, CKK_pad]  selected expert's weights, (kh,kw,c) order
    # out_ref : VMEM [1, EW, HW]       lane-dense output (HW multiple of 128)
    # pt_ref  : VMEM [CKK_pad, HW]     scratch patch matrix (contraction on sublanes)
    del ord_ref, sexp_ref
    HW = H * W

    # Zero the padded tail of the contraction dim every step (cheap; keeps the
    # scratch well-defined under megacore "parallel" sharding of the grid).
    if CKK_pad > CKK:
        pt_ref[CKK:CKK_pad, :] = jnp.zeros((CKK_pad - CKK, HW), pt_ref.dtype)

    y = y_ref[0]                                              # [Cin, HW + 2*PW]
    col = jax.lax.broadcasted_iota(jnp.int32, (1, HW), 1) % W  # ow per flat index

    # Build the K*K conv taps as static slices of the halo'd flat input.
    # Vertical out-of-range taps land in the zero halo; horizontal wrap-around
    # is killed with a lane mask.
    for kh in range(K):
        for kw in range(K):
            s = kh * W + kw
            slab = y[:, s:s + HW]                             # [Cin, HW]
            if kw != pad:
                valid = (col >= pad - kw) & (col < W + pad - kw)
                slab = jnp.where(valid, slab, jnp.zeros_like(slab))
            r0 = (kh * K + kw) * Cin
            pt_ref[r0:r0 + Cin, :] = slab

    # One MXU matmul: [EW, CKK_pad] @ [CKK_pad, HW] -> [EW, HW]  (lane-dense N)
    acc = jnp.dot(w_ref[0], pt_ref[...], preferred_element_type=jnp.float32)
    out_ref[0] = acc.astype(out_ref.dtype)


def moe_conv_forward(x, weight, scores, *, n_expert, expert_width, padding=1,
                     compute_dtype=None):
    """x: [B, Cin, H, W] (NCHW), weight: [n_expert*EW, Cin, K, K] (OIHW),
    scores: [B, n_expert]. Returns [B, EW, H, W] (NCHW)."""
    assert n_expert > 1
    B, Cin, H, W = x.shape
    K = weight.shape[-1]
    assert weight.shape == (n_expert * expert_width, Cin, K, K)
    assert K == 2 * padding + 1, "only stride=1 'same' convolution is implemented"

    HW = H * W
    CKK = Cin * K * K
    CKK_pad = ((CKK + 127) // 128) * 128
    PW = padding * W + padding
    cdt = compute_dtype if compute_dtype is not None else x.dtype

    # --- glue: flattened input with a small zero halo (no 9x im2col in HBM) ---
    y = jnp.pad(x.reshape(B, Cin, HW), ((0, 0), (0, 0), (PW, PW))).astype(cdt)

    # --- glue: weight [n_expert*EW, Cin, K, K] -> [n_expert, EW, (kh,kw,c)] padded ---
    w = weight.reshape(n_expert, expert_width, Cin, K, K)
    w = w.transpose(0, 1, 3, 4, 2).reshape(n_expert, expert_width, CKK)
    w = jnp.pad(w, ((0, 0), (0, 0), (0, CKK_pad - CKK))).astype(cdt)

    # --- glue: routing (GetMask forward = argmax). Group batches by expert so
    #     consecutive grid steps with the same expert skip the weight DMA. ---
    expert_idx = jnp.argmax(scores, axis=1).astype(jnp.int32)     # [B]
    order = jnp.argsort(expert_idx).astype(jnp.int32)             # [B]
    sorted_expert = expert_idx[order].astype(jnp.int32)           # [B]

    kernel = functools.partial(_moe_conv_kernel, Cin=Cin, H=H, W=W, K=K,
                               pad=padding, CKK=CKK, CKK_pad=CKK_pad)

    out = pl.pallas_call(
        kernel,
        out_shape=jax.ShapeDtypeStruct((B, expert_width, HW), x.dtype),
        grid_spec=pltpu.PrefetchScalarGridSpec(
            num_scalar_prefetch=2,
            grid=(B,),
            in_specs=[
                # input block of the (expert-sorted) batch element
                pl.BlockSpec((1, Cin, HW + 2 * PW),
                             lambda b, ord_ref, se_ref: (ord_ref[b], 0, 0)),
                # data-dependent expert weight block (the MoE mask+gather)
                pl.BlockSpec((1, expert_width, CKK_pad),
                             lambda b, ord_ref, se_ref: (se_ref[b], 0, 0)),
            ],
            out_specs=pl.BlockSpec((1, expert_width, HW),
                                   lambda b, ord_ref, se_ref: (ord_ref[b], 0, 0)),
            scratch_shapes=[pltpu.VMEM((CKK_pad, HW), cdt)],
        ),
        compiler_params=pltpu.CompilerParams(dimension_semantics=("parallel",)),
    )(order, sorted_expert, y, w)

    # [B, EW, HW] -> [B, EW, H, W] : pure reshape (already NCHW ordered).
    return out.reshape(B, expert_width, H, W)


if __name__ == "__main__":
    # Matches MoEConv(in_channels=4, out_channels=8, kernel_size=3, stride=1,
    #                 padding=1, bias=False, n_expert=5)
    B, Cin, H, W = 2, 4, 16, 16
    expert_width = 8
    n_expert = 5
    K = 3
    Cout_total = expert_width * n_expert

    key = jax.random.PRNGKey(0)
    kx, kw, ks = jax.random.split(key, 3)
    x = jax.random.normal(kx, (B, Cin, H, W), dtype=jnp.float32)
    weight = jax.random.normal(kw, (Cout_total, Cin, K, K), dtype=jnp.float32) * 0.1
    scores = jax.random.normal(ks, (B, n_expert), dtype=jnp.float32)

    # Reference: full conv over all experts, then per-batch expert-block slice
    # (exactly what mask-multiply + gather does in the PyTorch forward).
    full = jax.lax.conv_general_dilated(
        x, weight, window_strides=(1, 1), padding=((1, 1), (1, 1)),
        dimension_numbers=("NCHW", "OIHW", "NCHW"))
    eidx = np.asarray(jnp.argmax(scores, axis=1))
    ref = np.stack([
        np.asarray(full)[b, int(eidx[b]) * expert_width:(int(eidx[b]) + 1) * expert_width]
        for b in range(B)
    ])

    # f32 path (exact parity with the PyTorch module numerics).
    out = moe_conv_forward(x, weight, scores, n_expert=n_expert,
                           expert_width=expert_width, padding=1)
    out = jax.block_until_ready(out)
    assert out.shape == (B, expert_width, H, W)
    np.testing.assert_allclose(np.asarray(out), ref, rtol=1e-5, atol=1e-5)

    # bf16 compute path (halved HBM/VMEM traffic; f32 MXU accumulation).
    out_bf16 = moe_conv_forward(x, weight, scores, n_expert=n_expert,
                                expert_width=expert_width, padding=1,
                                compute_dtype=jnp.bfloat16)
    out_bf16 = jax.block_until_ready(out_bf16)
    np.testing.assert_allclose(np.asarray(out_bf16), ref, rtol=5e-2, atol=5e-2)

    print("KERNEL_OK")
</pallas_src>

<mosaic_0001>
module attributes {stable_mosaic.version = 11 : i64} {
  func.func @_moe_conv_kernel(%arg0: i32, %arg1: memref<2xi32, #tpu.memory_space<smem>>, %arg2: memref<2xi32, #tpu.memory_space<smem>>, %arg3: memref<1x4x290xf32, #tpu.memory_space<vmem>>, %arg4: memref<1x8x128xf32, #tpu.memory_space<vmem>>, %arg5: memref<1x8x256xf32, #tpu.memory_space<vmem>>, %arg6: memref<128x256xf32, #tpu.memory_space<vmem>>) attributes {dimension_semantics = [#tpu.dimension_semantics<parallel>], iteration_bounds = array<i64: 2>, scalar_prefetch = 2 : i64, scratch_operands = 1 : i64, tpu.core_type = #tpu.core_type<tc>, window_params = [{transform_indices = @transform_0, window_bounds = array<i64: 1, 4, 290>}, {transform_indices = @transform_1, window_bounds = array<i64: 1, 8, 128>}, {transform_indices = @transform_2, window_bounds = array<i64: 1, 8, 256>}]} {
    %cst = arith.constant 0.000000e+00 : f32
    %0 = vector.broadcast %cst : f32 to vector<92x256xf32>
    %c36 = arith.constant 36 : index
    %c0 = arith.constant 0 : index
    %1 = vector.load %arg6[%c36, %c0] : memref<128x256xf32, #tpu.memory_space<vmem>>, vector<92x256xf32>
    tpu.vector_store %arg6[%c36, %c0], %0 {strides = array<i32>} : memref<128x256xf32, #tpu.memory_space<vmem>>, vector<92x256xf32>,
    %c0_0 = arith.constant 0 : index
    %c0_1 = arith.constant 0 : index
    %c0_2 = arith.constant 0 : index
    %2 = vector.load %arg3[%c0_0, %c0_1, %c0_2] : memref<1x4x290xf32, #tpu.memory_space<vmem>>, vector<1x4x290xf32>
    %3 = vector.shape_cast %2 : vector<1x4x290xf32> to vector<4x290xf32>
    %4 = tpu.iota {dimensions = array<i32: 1>} : vector<1x256xi32>
    %c16_i32 = arith.constant 16 : i32
    %c0_i32 = arith.constant 0 : i32
    %5 = arith.cmpi eq, %c16_i32, %c0_i32 : i32
    %c1_i32 = arith.constant 1 : i32
    %6 = arith.select %5, %c1_i32, %c16_i32 : i32
    %7 = vector.broadcast %6 : i32 to vector<1x256xi32>
    %8 = arith.remsi %4, %7 : vector<1x256xi32>
    %c0_i32_3 = arith.constant 0 : i32
    %9 = vector.broadcast %c0_i32_3 : i32 to vector<1x256xi32>
    %10 = arith.cmpi ne, %8, %9 : vector<1x256xi32>
    %c0_i32_4 = arith.constant 0 : i32
    %11 = vector.broadcast %c0_i32_4 : i32 to vector<1x256xi32>
    %12 = arith.cmpi slt, %8, %11 : vector<1x256xi32>
    %c0_i32_5 = arith.constant 0 : i32
    %13 = arith.cmpi slt, %6, %c0_i32_5 : i32
    %14 = vector.broadcast %13 : i1 to vector<1x256xi1>
    %15 = vector.broadcast %14 : vector<1x256xi1> to vector<1x256xi1>
    %16 = arith.xori %12, %15 : vector<1x256xi1>
    %17 = arith.andi %16, %10 : vector<1x256xi1>
    %18 = vector.broadcast %6 : i32 to vector<1x256xi32>
    %19 = arith.addi %8, %18 : vector<1x256xi32>
    %20 = arith.select %17, %19, %8 : vector<1x256xi1>, vector<1x256xi32>
    %21 = vector.extract_strided_slice %3 {offsets = [0, 0], sizes = [4, 256], strides = [1, 1]} : vector<4x290xf32> to vector<4x256xf32>
    %c1_i32_6 = arith.constant 1 : i32
    %22 = vector.broadcast %c1_i32_6 : i32 to vector<1x256xi32>
    %23 = arith.cmpi sge, %20, %22 : vector<1x256xi32>
    %c17_i32 = arith.constant 17 : i32
    %24 = vector.broadcast %c17_i32 : i32 to vector<1x256xi32>
    %25 = arith.cmpi slt, %20, %24 : vector<1x256xi32>
    %26 = arith.andi %23, %25 : vector<1x256xi1>
    %cst_7 = arith.constant 0.000000e+00 : f32
    %27 = vector.broadcast %cst_7 : f32 to vector<4x256xf32>
    %28 = vector.shape_cast %26 : vector<1x256xi1> to vector<1x256xi1>
    %29 = vector.broadcast %28 : vector<1x256xi1> to vector<4x256xi1>
    %30 = arith.select %29, %21, %27 : vector<4x256xi1>, vector<4x256xf32>
    %c0_8 = arith.constant 0 : index
    %c0_9 = arith.constant 0 : index
    %31 = vector.load %arg6[%c0_8, %c0_9] : memref<128x256xf32, #tpu.memory_space<vmem>>, vector<4x256xf32>
    tpu.vector_store %arg6[%c0_8, %c0_9], %30 {strides = array<i32>} : memref<128x256xf32, #tpu.memory_space<vmem>>, vector<4x256xf32>,
    %32 = vector.extract_strided_slice %3 {offsets = [0, 1], sizes = [4, 256], strides = [1, 1]} : vector<4x290xf32> to vector<4x256xf32>
    %c4 = arith.constant 4 : index
    %c0_10 = arith.constant 0 : index
    %33 = vector.load %arg6[%c4, %c0_10] : memref<128x256xf32, #tpu.memory_space<vmem>>, vector<4x256xf32>
    tpu.vector_store %arg6[%c4, %c0_10], %32 {strides = array<i32>} : memref<128x256xf32, #tpu.memory_space<vmem>>, vector<4x256xf32>,
    %34 = vector.extract_strided_slice %3 {offsets = [0, 2], sizes = [4, 256], strides = [1, 1]} : vector<4x290xf32> to vector<4x256xf32>
    %c-1_i32 = arith.constant -1 : i32
    %35 = vector.broadcast %c-1_i32 : i32 to vector<1x256xi32>
    %36 = arith.cmpi sge, %20, %35 : vector<1x256xi32>
    %c15_i32 = arith.constant 15 : i32
    %37 = vector.broadcast %c15_i32 : i32 to vector<1x256xi32>
    %38 = arith.cmpi slt, %20, %37 : vector<1x256xi32>
    %39 = arith.andi %36, %38 : vector<1x256xi1>
    %cst_11 = arith.constant 0.000000e+00 : f32
    %40 = vector.broadcast %cst_11 : f32 to vector<4x256xf32>
    %41 = vector.shape_cast %39 : vector<1x256xi1> to vector<1x256xi1>
    %42 = vector.broadcast %41 : vector<1x256xi1> to vector<4x256xi1>
    %43 = arith.select %42, %34, %40 : vector<4x256xi1>, vector<4x256xf32>
    %c8 = arith.constant 8 : index
    %c0_12 = arith.constant 0 : index
    %44 = vector.load %arg6[%c8, %c0_12] : memref<128x256xf32, #tpu.memory_space<vmem>>, vector<4x256xf32>
    tpu.vector_store %arg6[%c8, %c0_12], %43 {strides = array<i32>} : memref<128x256xf32, #tpu.memory_space<vmem>>, vector<4x256xf32>,
    %45 = vector.extract_strided_slice %3 {offsets = [0, 16], sizes = [4, 256], strides = [1, 1]} : vector<4x290xf32> to vector<4x256xf32>
    %c1_i32_13 = arith.constant 1 : i32
    %46 = vector.broadcast %c1_i32_13 : i32 to vector<1x256xi32>
    %47 = arith.cmpi sge, %20, %46 : vector<1x256xi32>
    %c17_i32_14 = arith.constant 17 : i32
    %48 = vector.broadcast %c17_i32_14 : i32 to vector<1x256xi32>
    %49 = arith.cmpi slt, %20, %48 : vector<1x256xi32>
    %50 = arith.andi %47, %49 : vector<1x256xi1>
    %cst_15 = arith.constant 0.000000e+00 : f32
    %51 = vector.broadcast %cst_15 : f32 to vector<4x256xf32>
    %52 = vector.shape_cast %50 : vector<1x256xi1> to vector<1x256xi1>
    %53 = vector.broadcast %52 : vector<1x256xi1> to vector<4x256xi1>
    %54 = arith.select %53, %45, %51 : vector<4x256xi1>, vector<4x256xf32>
    %c12 = arith.constant 12 : index
    %c0_16 = arith.constant 0 : index
    %55 = vector.load %arg6[%c12, %c0_16] : memref<128x256xf32, #tpu.memory_space<vmem>>, vector<4x256xf32>
    tpu.vector_store %arg6[%c12, %c0_16], %54 {strides = array<i32>} : memref<128x256xf32, #tpu.memory_space<vmem>>, vector<4x256xf32>,
    %56 = vector.extract_strided_slice %3 {offsets = [0, 17], sizes = [4, 256], strides = [1, 1]} : vector<4x290xf32> to vector<4x256xf32>
    %c16 = arith.constant 16 : index
    %c0_17 = arith.constant 0 : index
    %57 = vector.load %arg6[%c16, %c0_17] : memref<128x256xf32, #tpu.memory_space<vmem>>, vector<4x256xf32>
    tpu.vector_store %arg6[%c16, %c0_17], %56 {strides = array<i32>} : memref<128x256xf32, #tpu.memory_space<vmem>>, vector<4x256xf32>,
    %58 = vector.extract_strided_slice %3 {offsets = [0, 18], sizes = [4, 256], strides = [1, 1]} : vector<4x290xf32> to vector<4x256xf32>
    %c-1_i32_18 = arith.constant -1 : i32
    %59 = vector.broadcast %c-1_i32_18 : i32 to vector<1x256xi32>
    %60 = arith.cmpi sge, %20, %59 : vector<1x256xi32>
    %c15_i32_19 = arith.constant 15 : i32
    %61 = vector.broadcast %c15_i32_19 : i32 to vector<1x256xi32>
    %62 = arith.cmpi slt, %20, %61 : vector<1x256xi32>
    %63 = arith.andi %60, %62 : vector<1x256xi1>
    %cst_20 = arith.constant 0.000000e+00 : f32
    %64 = vector.broadcast %cst_20 : f32 to vector<4x256xf32>
    %65 = vector.shape_cast %63 : vector<1x256xi1> to vector<1x256xi1>
    %66 = vector.broadcast %65 : vector<1x256xi1> to vector<4x256xi1>
    %67 = arith.select %66, %58, %64 : vector<4x256xi1>, vector<4x256xf32>
    %c20 = arith.constant 20 : index
    %c0_21 = arith.constant 0 : index
    %68 = vector.load %arg6[%c20, %c0_21] : memref<128x256xf32, #tpu.memory_space<vmem>>, vector<4x256xf32>
    tpu.vector_store %arg6[%c20, %c0_21], %67 {strides = array<i32>} : memref<128x256xf32, #tpu.memory_space<vmem>>, vector<4x256xf32>,
    %69 = vector.extract_strided_slice %3 {offsets = [0, 32], sizes = [4, 256], strides = [1, 1]} : vector<4x290xf32> to vector<4x256xf32>
    %c1_i32_22 = arith.constant 1 : i32
    %70 = vector.broadcast %c1_i32_22 : i32 to vector<1x256xi32>
    %71 = arith.cmpi sge, %20, %70 : vector<1x256xi32>
    %c17_i32_23 = arith.constant 17 : i32
    %72 = vector.broadcast %c17_i32_23 : i32 to vector<1x256xi32>
    %73 = arith.cmpi slt, %20, %72 : vector<1x256xi32>
    %74 = arith.andi %71, %73 : vector<1x256xi1>
    %cst_24 = arith.constant 0.000000e+00 : f32
    %75 = vector.broadcast %cst_24 : f32 to vector<4x256xf32>
    %76 = vector.shape_cast %74 : vector<1x256xi1> to vector<1x256xi1>
    %77 = vector.broadcast %76 : vector<1x256xi1> to vector<4x256xi1>
    %78 = arith.select %77, %69, %75 : vector<4x256xi1>, vector<4x256xf32>
    %c24 = arith.constant 24 : index
    %c0_25 = arith.constant 0 : index
    %79 = vector.load %arg6[%c24, %c0_25] : memref<128x256xf32, #tpu.memory_space<vmem>>, vector<4x256xf32>
    tpu.vector_store %arg6[%c24, %c0_25], %78 {strides = array<i32>} : memref<128x256xf32, #tpu.memory_space<vmem>>, vector<4x256xf32>,
    %80 = vector.extract_strided_slice %3 {offsets = [0, 33], sizes = [4, 256], strides = [1, 1]} : vector<4x290xf32> to vector<4x256xf32>
    %c28 = arith.constant 28 : index
    %c0_26 = arith.constant 0 : index
    %81 = vector.load %arg6[%c28, %c0_26] : memref<128x256xf32, #tpu.memory_space<vmem>>, vector<4x256xf32>
    tpu.vector_store %arg6[%c28, %c0_26], %80 {strides = array<i32>} : memref<128x256xf32, #tpu.memory_space<vmem>>, vector<4x256xf32>,
    %82 = vector.extract_strided_slice %3 {offsets = [0, 34], sizes = [4, 256], strides = [1, 1]} : vector<4x290xf32> to vector<4x256xf32>
    %c-1_i32_27 = arith.constant -1 : i32
    %83 = vector.broadcast %c-1_i32_27 : i32 to vector<1x256xi32>
    %84 = arith.cmpi sge, %20, %83 : vector<1x256xi32>
    %c15_i32_28 = arith.constant 15 : i32
    %85 = vector.broadcast %c15_i32_28 : i32 to vector<1x256xi32>
    %86 = arith.cmpi slt, %20, %85 : vector<1x256xi32>
    %87 = arith.andi %84, %86 : vector<1x256xi1>
    %cst_29 = arith.constant 0.000000e+00 : f32
    %88 = vector.broadcast %cst_29 : f32 to vector<4x256xf32>
    %89 = vector.shape_cast %87 : vector<1x256xi1> to vector<1x256xi1>
    %90 = vector.broadcast %89 : vector<1x256xi1> to vector<4x256xi1>
    %91 = arith.select %90, %82, %88 : vector<4x256xi1>, vector<4x256xf32>
    %c32 = arith.constant 32 : index
    %c0_30 = arith.constant 0 : index
    %92 = vector.load %arg6[%c32, %c0_30] : memref<128x256xf32, #tpu.memory_space<vmem>>, vector<4x256xf32>
    tpu.vector_store %arg6[%c32, %c0_30], %91 {strides = array<i32>} : memref<128x256xf32, #tpu.memory_space<vmem>>, vector<4x256xf32>,
    %c0_31 = arith.constant 0 : index
    %c0_32 = arith.constant 0 : index
    %c0_33 = arith.constant 0 : index
    %93 = vector.load %arg4[%c0_31, %c0_32, %c0_33] : memref<1x8x128xf32, #tpu.memory_space<vmem>>, vector<1x8x128xf32>
    %94 = vector.shape_cast %93 : vector<1x8x128xf32> to vector<8x128xf32>
    %c0_34 = arith.constant 0 : index
    %c0_35 = arith.constant 0 : index
    %95 = vector.load %arg6[%c0_34, %c0_35] : memref<128x256xf32, #tpu.memory_space<vmem>>, vector<128x256xf32>
    %cst_36 = arith.constant dense<0.000000e+00> : vector<8x256xf32>
    %96 = tpu.matmul %94, %95, %cst_36 {dimension_numbers = #tpu.dot_dimension_numbers<[1], [0], [0], [1], [0, 0, 1, 1], [], []>} : vector<8x128xf32>, vector<128x256xf32>, vector<8x256xf32> -> vector<8x256xf32>
    %c0_37 = arith.constant 0 : index
    %c0_38 = arith.constant 0 : index
    %c0_39 = arith.constant 0 : index
    %97 = vector.load %arg5[%c0_37, %c0_38, %c0_39] : memref<1x8x256xf32, #tpu.memory_space<vmem>>, vector<1x8x256xf32>
    %98 = vector.shape_cast %97 : vector<1x8x256xf32> to vector<8x256xf32>
    %99 = vector.shape_cast %96 : vector<8x256xf32> to vector<1x8x256xf32>
    tpu.vector_store %arg5[%c0_37, %c0_38, %c0_39], %99 {strides = array<i32>} : memref<1x8x256xf32, #tpu.memory_space<vmem>>, vector<1x8x256xf32>,
    return
  }
  func.func @transform_0(%arg0: i32, %arg1: memref<2xi32, #tpu.memory_space<smem>>, %arg2: memref<2xi32, #tpu.memory_space<smem>>) -> (i32, i32, i32) {
    %0 = arith.index_cast %arg0 : i32 to index
    %1 = memref.load %arg1[%0] : memref<2xi32, #tpu.memory_space<smem>>
    %c0_i32 = arith.constant 0 : i32
    %c0_i32_0 = arith.constant 0 : i32
    %c0_i32_1 = arith.constant 0 : i32
    return %1, %c0_i32, %c0_i32_0 : i32, i32, i32
  }
  func.func @transform_1(%arg0: i32, %arg1: memref<2xi32, #tpu.memory_space<smem>>, %arg2: memref<2xi32, #tpu.memory_space<smem>>) -> (i32, i32, i32) {
    %0 = arith.index_cast %arg0 : i32 to index
    %1 = memref.load %arg2[%0] : memref<2xi32, #tpu.memory_space<smem>>
    %c0_i32 = arith.constant 0 : i32
    %c0_i32_0 = arith.constant 0 : i32
    %c0_i32_1 = arith.constant 0 : i32
    return %1, %c0_i32, %c0_i32_0 : i32, i32, i32
  }
  func.func @transform_2(%arg0: i32, %arg1: memref<2xi32, #tpu.memory_space<smem>>, %arg2: memref<2xi32, #tpu.memory_space<smem>>) -> (i32, i32, i32) {
    %0 = arith.index_cast %arg0 : i32 to index
    %1 = memref.load %arg1[%0] : memref<2xi32, #tpu.memory_space<smem>>
    %c0_i32 = arith.constant 0 : i32
    %c0_i32_0 = arith.constant 0 : i32
    %c0_i32_1 = arith.constant 0 : i32
    return %1, %c0_i32, %c0_i32_0 : i32, i32, i32
  }
}

</mosaic_0001>

<bundles_post_ra>
// kernel: tpu_custom_call.1
= control target key start
LH: loop header
LB: loop body
LE: loop exit
PB: predicated region body
PF: predicated region fallthrough
CT: control target
= control target key end

     0   :  { %s1451_s0 = inlined_call_operand.hbm [shape: s32[2], index: 0, kind: input, shape index: {}]   ;;  %s1452_s2 = inlined_call_operand.hbm [shape: f32[2,4,290], index: 2, kind: input, shape index: {}]   ;;  %s1453_s3 = inlined_call_operand.hbm [shape: f32[5,8,128], index: 3, kind: input, shape index: {}]   ;;  %s1454_s4 = inlined_call_operand.hbm [shape: f32[2,8,256], index: 4, kind: output, shape index: {}]   ;;  %s1455_s1 = inlined_call_operand.vmem [shape: s32[2], index: 1, kind: input, shape index: {}]  }
   0x1   :  { %1463 = sst [smem:[#allocation24_spill]] %s1452_s2  ;;  %s815_s17 = scalar_lea.hbm %s1451_s0, 16 }
   0x2   :  { %p816_p0 = scmp.ne.s32.totalorder %s1451_s0, %s815_s17  ;;  %p819_p1 = scmp.lt.u32.totalorder %s815_s17, %s1451_s0 }
   0x4   :  { %p821_p2 = pnand %p819_p1, %p816_p0 }
   0x6   :  { %824 = shalt.err (!%p821_p2)  }
   0x7   :  { %s1019_s22 = smov [#allocation4]   ;;  %s11_s27 = sshll.u32 %s1455_s1, 4  ;;  %s12_s27 = int_to_ptr.vmem [resolvable:$true] %s11_s27 }
   0x8   :  { %10 = dma.hbm_to_smem %s1451_s0, 16, %s1019_s22, [#allocation3] }
   0x9   :  { %s825_s28 = scalar_lea.vmem %s12_s27, 16  ;;  %p830_p4 = scmp.lt.s32.totalorder %s12_s27, %s12_s27 }
   0xa   :  { %p826_p3 = scmp.ne.s32.totalorder %s12_s27, %s825_s28  ;;  %p831_p5 = scmp.lt.s32.totalorder %s825_s28, %s825_s28 }
   0xc   :  { %p832_p6 = por %p831_p5, %p830_p4 }
   0xe   :  { %p833_p7 = pnand %p832_p6, %p826_p3 }
  0x10   :  { %836 = shalt.err (!%p833_p7)  }
  0x11   :  { %s1020_s29 = smov [#allocation5]  }
  0x12   :  { %14 = dma.vmem_to_smem %s12_s27, 16, %s1020_s29, [#allocation3] }
  0x13   :  { %965 = dma.done.wait [#allocation3], 32 }
  0x14   :  { %966 = vsyncadd [#allocation3], 4294967264 }
  0x15   :  { %16 = sfence }
  0x16   :  { %17 = vsyncpa [#allocation7], 0 }
  0x17   :  { %19 = vsyncpa [#allocation7 + $0x1], 0 }
  0x18   :  { %20 = vsyncpa [#allocation10], 0 }
  0x19   :  { %22 = vsyncpa [#allocation10 + $0x1], 0 }
  0x1a   :  { %23 = vsyncpa [#allocation8], 0 }
  0x1b   :  { %25 = vsyncpa [#allocation8 + $0x1], 0  ;;  %s1074_s0 = smov 0   ;;  %s1076_s1 = smov 0  }
  0x1c   :  { %s1078_s30 = smov 0   ;;  %s1080_s5 = smov 0  }
  0x1d   :  { %s1082_s6 = smov 0   ;;  %s1084_s7 = smov 0  }
  0x1e   :  { %s1086_s8 = smov 0   ;;  %s1088_s9 = smov 0  }
  0x1f   :  { %s1090_s10 = smov 0   ;;  %s1092_s11 = smov 0  }
  0x20 LB: > { %1464 = sst [smem:[#allocation21_spill]] %s1013_s10  ;;  %s1123_s12 = sadd.s32 4294967295, %s1017_s11   ;;  %s1017_s11 = sphi %s1092_s11, %s1508_s11   ;;  %s1013_s10 = sphi %s1090_s10, %s1507_s10   ;;  %s1009_s9 = sphi %s1088_s9, %s1506_s9   ;;  %s1005_s8 = sphi %s1086_s8, %s1505_s8   ;;  %s1001_s7 = sphi %s1084_s7, %s1504_s7   ;;  %s997_s6 = sphi %s1082_s6, %s1503_s6   ;;  %s993_s5 = sphi %s1080_s5, %s1502_s5   ;;  %s989_s30 = sphi %s1078_s30, %s1501_s30   ;;  %s985_s1 = sphi %s1076_s1, %s1500_s1   ;;  %s981_s0 = sphi %s1074_s0, %s1499_s0  }
  0x21   : > { %s642_s13 = sadd.s32 4294967294, %s1017_s11   ;;  %s1127_s14 = sadd.s32 1, %s1017_s11  }
  0x22   : > { %s35_s15 = sld [smem:[#allocation4 + %s1017_s11]]  ;;  %s40_s17 = sadd.s32 1, %s1013_s10 }
  0x23   : > { %s36_s16 = sld [smem:[#allocation4 + %s1127_s14]]  ;;  %p47_p8 = scmp.ne.s32.totalorder %s1013_s10, %s1009_s9 }
  0x24   : > { %p1458_p9 = scmp.eq.s32.totalorder %s1017_s11, 0  ;;  %p53_p10 = scmp.ne.s32.totalorder %s1009_s9, %s1005_s8 }
  0x25   : > { %p1459_p11 = scmp.eq.s32.totalorder %s1123_s12, 0  ;;  %s91_s19 = sld [smem:[#allocation4 + %s1017_s11]] }
  0x26   : > { %p1139_p12 = por %p1458_p9, %p47_p8  ;;  %s92_s21 = sld [smem:[#allocation4 + %s1127_s14]] }
  0x27   : > { %p1146_p13 = por %p1459_p11, %p53_p10  ;;  %s96_s22 = sadd.s32 1, %s989_s30 }
  0x28   : > { %p106_p0 = scmp.ne.s32.totalorder %s989_s30, %s985_s1  ;;  %p107_p1 = scmp.eq.s32.totalorder %s1123_s12, 1 }
  0x29   : > { %s1466_s20 = scalar_select %p1146_p13, 1, 0 }
  0x2a   : > { %s37_s23 = ssub.s32 %s35_s15, %s36_s16  ;;  %p112_p3 = scmp.ne.s32.totalorder %s985_s1, %s981_s0 }
  0x2b   : > { %p38_p2 = scmp.eq.s32.totalorder %s37_s23, 0  ;;  %p1157_p4 = por %p107_p1, %p106_p0 }
  0x2c   : > { %p113_p5 = scmp.eq.s32.totalorder %s642_s13, 1  ;;  %s93_s26 = ssub.s32 %s91_s19, %s92_s21 }
  0x2d   : > { %s1467_s24 = scalar_select %p1157_p4, 1, 0 }
  0x2e   : > { %s1162_s25 = scalar_select %p38_p2, %s1013_s10, %s40_s17  }
  0x2f   : > { %p1164_p6 = por %p113_p5, %p112_p3  ;;  %p94_p7 = scmp.eq.s32.totalorder %s93_s26, 0 }
  0x30   : > { %1468 = sst [smem:[#allocation22_spill]] %s1162_s25  ;;  %p1457_p10 = scmp.lt.s32.totalorder %s1017_s11, 2 }
  0x31   : > { %s1469_s27 = scalar_select %p1164_p6, 1, 0 }
  0x32   : > { %s133_s28 = sand.u32 1, %s1013_s10   ;;  %p1180_p0 = pnand %p1457_p10, %p1139_p12 }
  0x33   : > { %s1172_s29 = scalar_select %p94_p7, %s989_s30, %s96_s22  }
  0x34   : > { %s689_s8 = smul.u32 12, %s133_s28  ;;  %p648_p1 = scmp.ge.s32.totalorder %s1017_s11, 1 }
  0x35   : > { %s692_s13 = scalar_select %p1139_p12, [#allocation4], [#allocation12] }
  0x36   : > { %s693_s16 = scalar_select %p1139_p12, %s1017_s11, 0 }
  0x37   : > { %s1510_s13 = smov (!%p1457_p10, %s692_s13), [#allocation15]  ;;  %s137_s17 = scalar_lea.vmem [#allocation6], %s689_s8 }
  0x38   : > { %s1512_s16 = smov (!%p1457_p10, %s693_s16), 0  ;;  %s146_s19 = sshll.u32 %s137_s17, 4  ;;  %s1191_s19 = int_to_ptr.vmem [resolvable:$true] %s146_s19 }
  0x39   : > { %s138_s21 = sld [smem:[%s1510_s13 + %s1512_s16]]  ;;  %p170_p2 = scmp.lt.s32.totalorder %s1017_s11, 3 }
  0x3a   : > { %s1200_s18 = sld [smem:[#allocation5 + %s1017_s11]]  ;;  %s134_s13 = scalar_lea.sflag [#allocation7], %s133_s28 }
  0x3b   : > { %p1195_p3 = pnand %p648_p1, %p170_p2  ;;  %s1203_s26 = sld [smem:[#allocation5 + %s1127_s14]] }
  0x3c   : > { %s1472_s2 = sld [smem:[#allocation24_spill]]  ;;  %p839_p1 = pneg %p1180_p0 }
  0x3f   : > { %s690_s23 = smul.u32 192, %s138_s21 }
  0x42   : > { %s1210_s17 = scalar_lea.hbm %s1472_s2, %s690_s23  ;;  %s842_s25 = scalar_lea.hbm %s1472_s2, 384 }
  0x43   : > { %s837_s16 = scalar_lea.hbm %s1210_s17, 192  ;;  %p843_p10 = scmp.lt.u32.totalorder %s1210_s17, %s1472_s2 }
  0x44   : > { %p838_p7 = scmp.ne.s32.totalorder %s1210_s17, %s837_s16  ;;  %p844_p12 = scmp.lt.u32.totalorder %s842_s25, %s837_s16 }
  0x45   : > { %p846_p5 = scmp.lt.u32.totalorder %s837_s16, %s1210_s17 }
  0x46   : > { %p840_p2 = pnand %p839_p1, %p838_p7  ;;  %p845_p9 = por %p844_p12, %p843_p10 }
  0x48   : > { %p841_p8 = pneg %p840_p2  ;;  %p847_p11 = por %p846_p5, %p845_p9 }
  0x4a   : > { %p848_p6 = pnand %p847_p11, %p841_p8 }
  0x4c   : > { %851 = shalt.err (!%p848_p6)
}
  0x4d   : > { %s852_s28 = scalar_lea.vmem %s1191_s19, 192  ;;  %s1021_s10 = smov [#allocation6]  }
  0x4e   : > { %p853_p7 = scmp.ne.s32.totalorder %s1191_s19, %s852_s28  ;;  %s857_s21 = sshll.u32 %s1021_s10, 4  ;;  %s858_s21 = int_to_ptr.vmem [resolvable:$false] %s857_s21 }
  0x4f   : > { %s859_s23 = scalar_lea.vmem %s858_s21, 384  ;;  %p860_p13 = scmp.lt.s32.totalorder %s1191_s19, %s858_s21 }
  0x50   : > { %p855_p2 = pnand %p853_p7, %p839_p1  ;;  %p861_p10 = scmp.lt.s32.totalorder %s859_s23, %s852_s28 }
  0x52   : > { %p856_p4 = pneg %p855_p2  ;;  %p862_p12 = por %p861_p10, %p860_p13 }
  0x54   : > { %p863_p9 = pnand %p862_p12, %p856_p4 }
  0x56   : > { %866 = shalt.err (!%p863_p9)
}
  0x57   : > { %709 = dma.hbm_to_vmem [thread:$0]  (!%p1180_p0), %s1210_s17, 192, %s1191_s19, %s134_s13  }
  0x58   : > { %p1473_p11 = scmp.eq.s32.totalorder %s1123_s12, 0  ;;  %p1474_p13 = scmp.ne.s32.totalorder %s997_s6, %s993_s5 }
  0x59   : > { %s68_s16 = sadd.s32 1, %s1001_s7  ;;  %s153_s25 = sand.u32 1, %s1001_s7  }
  0x5a   : > { %p1244_p4 = por %p1474_p13, %p1473_p11  ;;  %s65_s8 = ssub.s32 %s1200_s18, %s1203_s26 }
  0x5b   : > { %p1476_p6 = scmp.eq.s32.totalorder %s1017_s11, 0  ;;  %p1477_p8 = scmp.ne.s32.totalorder %s1001_s7, %s997_s6 }
  0x5c   : > { %s1475_s15 = scalar_select %p1244_p4, 1, 0 }
  0x5d   : > { %p77_p5 = por %p1477_p8, %p1476_p6  ;;  %p66_p1 = scmp.eq.s32.totalorder %s65_s8, 0 }
  0x5e   : > { %s646_s28 = sshll.u32 %s153_s25, 3  ;;  %p1478_p7 = scmp.lt.s32.totalorder %s1017_s11, 2 }
  0x5f   : > { %s1264_s5 = scalar_select %p66_p1, %s1001_s7, %s68_s16  }
  0x60   : > { %p1259_p2 = pnand %p1478_p7, %p77_p5  ;;  %p1481_p0 = pmov %p1478_p7 }
  0x61   : > { %1480 = sst [smem:[#allocation23_spill]] %s1264_s5  ;;  %s157_s26 = scalar_lea.vmem [#allocation9], %s646_s28 }
  0x62   : > { %s695_s19 = scalar_select %p77_p5, [#allocation5], [#allocation13] }
  0x63   : > { %s696_s17 = scalar_select %p77_p5, %s1017_s11, 0 }
  0x64   : > { %s1514_s19 = smov (!%p1481_p0, %s695_s19), [#allocation16]  ;;  %p1482_p10 = pmov %p1481_p0 }
  0x65   : > { %s165_s13 = sshll.u32 %s157_s26, 4  ;;  %s154_s16 = scalar_lea.sflag [#allocation10], %s153_s25  ;;  %s1271_s13 = int_to_ptr.vmem [resolvable:$true] %s165_s13 }
  0x66   : > { %s1516_s17 = smov (!%p1482_p10, %s696_s17), 0  ;;  %p869_p9 = pneg %p1259_p2 }
  0x67   : > { %s158_s18 = sld [smem:[%s1514_s19 + %s1516_s17]]  ;;  %s872_s17 = scalar_lea.hbm %s1453_s3, 640 }
  0x6d   : > { %s647_s21 = sshll.u32 %s158_s18, 7 }
  0x6e   : > { %s1276_s2 = scalar_lea.hbm %s1453_s3, %s647_s21 }
  0x6f   : > { %s867_s5 = scalar_lea.hbm %s1276_s2, 128  ;;  %p873_p6 = scmp.lt.u32.totalorder %s1276_s2, %s1453_s3 }
  0x70   : > { %p868_p12 = scmp.ne.s32.totalorder %s1276_s2, %s867_s5  ;;  %p874_p8 = scmp.lt.u32.totalorder %s872_s17, %s867_s5 }
  0x71   : > { %p876_p1 = scmp.lt.u32.totalorder %s867_s5, %s1276_s2 }
  0x72   : > { %p870_p11 = pnand %p869_p9, %p868_p12  ;;  %p875_p5 = por %p874_p8, %p873_p6 }
  0x74   : > { %p871_p13 = pneg %p870_p11  ;;  %p877_p7 = por %p876_p1, %p875_p5 }
  0x76   : > { %p878_p0 = pnand %p877_p7, %p871_p13 }
  0x78   : > { %881 = shalt.err (!%p878_p0)
}
  0x79   : > { %s882_s25 = scalar_lea.vmem %s1271_s13, 128  ;;  %s1022_s21 = smov [#allocation9]  }
  0x7a   : > { %p883_p10 = scmp.ne.s32.totalorder %s1271_s13, %s882_s25  ;;  %s887_s23 = sshll.u32 %s1022_s21, 4  ;;  %s888_s23 = int_to_ptr.vmem [resolvable:$false] %s887_s23 }
  0x7b   : > { %s889_s8 = scalar_lea.vmem %s888_s23, 256  ;;  %p890_p4 = scmp.lt.s32.totalorder %s1271_s13, %s888_s23 }
  0x7c   : > { %p885_p12 = pnand %p883_p10, %p869_p9  ;;  %p891_p6 = scmp.lt.s32.totalorder %s889_s8, %s882_s25 }
  0x7e   : > { %p886_p11 = pneg %p885_p12  ;;  %p892_p8 = por %p891_p6, %p890_p4 }
  0x80   : > { %p893_p5 = pnand %p892_p8, %p886_p11 }
  0x82   : > { %896 = shalt.err (!%p893_p5)
}
  0x83   : > { %714 = dma.hbm_to_vmem [thread:$0]  (!%p1259_p2), %s1276_s2, 128, %s1271_s13, %s154_s16  }
  0x84   : > { %174 = sbr.rel (%p1195_p3) target bundleno = 567 (0x237), region = 28  ;;  %s176_s5 = sand.u32 (!%p1195_p3), 1, %s1009_s9  }
  0x85   : > { %s691_s28 = smul.u32 (!%p1195_p3), 12, %s176_s5  ;;  %s177_s19 = scalar_lea.sflag (!%p1195_p3), [#allocation7], %s176_s5 }
  0x86   : > { %p1483_p9 = scmp.ne.s32.totalorder (!%p1195_p3), %s1466_s20, 0 }
  0x87   : > { %s180_s17 = scalar_lea.vmem (!%p1195_p3), [#allocation6], %s691_s28 }
  0x8b   : > { %968 = dma.done.wait (%p1483_p9), %s177_s19, 192  }
  0x8c   : > { %970 = vsyncadd (%p1483_p9), %s177_s19, 4294967104  ;;  %s185_s10 = sand.u32 1, %s997_s6   ;;  %p1484_p3 = scmp.ne.s32.totalorder %s1475_s15, 0 }
  0x8d   : > { %s1311_s18 = sshll.u32 %s185_s10, 3  ;;  %s186_s2 = scalar_lea.sflag [#allocation10], %s185_s10 }
  0x8e   : > { %s189_s22 = scalar_lea.vmem [#allocation9], %s1311_s18 }
  0x8f   : > { %972 = dma.done.wait (%p1484_p3), %s186_s2, 128  }
  0x90   : > { %974 = vsyncadd (%p1484_p3), %s186_s2, 4294967168  ;;  %v244_v0 = vlaneseq  ;;  %v243_v5 = vld [vmem:[%s180_s17 + $0x8] sm:$0xf]  ;;  %v242_v6 = vld [vmem:[%s180_s17] sm:$0xff]  ;;  %s1023_s20 = smov 112   ;;  %s1024_s15 = smov 126  }
  0x91   : > { %333 = vrot.lane.b32.xlu0 %v243_v5, %s1023_s20  ;;  %329 = vrot.lane.b32.xlu1 %v242_v6, %s1023_s20  ;;  %v282_v7 = vcombine.high %v242_v6, %v242_v6  ;;  %s1025_s13 = smov 127   ;;  %v290_v12 = vcombine.low %v243_v5, %v243_v5  ;;  %v289_v13 = vcombine.low %v242_v6, %v242_v6  ;;  %s1026_s16 = smov 110   ;;  %v1030_v14 = vmov 0.0  }
  0x92   : > { %v1318_v1 = vand.u32 127, %v244_v0  ;;  %s1027_s26 = smov 96   ;;  %s1028_s25 = smov 111   ;;  %219 = vst [vmem:[#allocation2 + $0x48] sm:$0xf0] %v1030_v14  ;;  %524 = vmatprep.mubr.f32.mxu0 %v1030_v14  ;;  %vm320_vm2 = vcmask 1031168  }
  0x93   : > { %s1029_s21 = smov 95   ;;  %218 = vst [vmem:[#allocation2 + $0x40] sm:$0xf0] %v1030_v14  ;;  %s1031_s23 = smov 94   ;;  %vm335_vm3 = vcmask 916480   ;;  %vm297_vm5 = vcmask 1039360  }
  0x94   : > { %v246_v2 = vadd.s32 128, %v1318_v1  ;;  %v251_v3 = vand.u32 15, %v1318_v1  ;;  %vm369_vm7 = vcmask 900096   ;;  %vm390_vm8 = vcmask 785408   ;;  %p1493_p4 = scmp.ne.s32.totalorder %s1467_s24, 0  ;;  %s212_s5 = sand.u32 1, %s985_s1  }
  0x95   : > { %318 = vrot.lane.b32.xlu0 %v243_v5, %s1024_s15  ;;  %293 = vrot.lane.b32.xlu1 %v242_v6, %s1025_s13  ;;  %vm356_vm9 = vcmask 908288   ;;  %vm405_vm10 = vcmask 777216   ;;  %vm418_vm11 = vcmask 769024   ;;  %v1032_v19 = vmov 0.0|0.0   ;;  %s650_s19 = sshll.u32 %s212_s5, 4 }
  0x96   : > { %v258_v4 = vand.u32 15, %v246_v2  ;;  %vm1324_vm0 = vcmp.ge.s32.totalorder %v251_v3, 1  ;;  %vm1352_vm6 = vcmp.lt.s32.totalorder %v251_v3, 15  ;;  %s700_s8 = scalar_select %p1493_p4, [#allocation4], [#allocation14] }
  0x97   : > { %v284_v10 = vsel %vm1324_vm0, %v242_v6, 0.0  ;;  %s1518_s12 = smov (!%p1493_p4, %s1123_s12), 0  ;;  %s214_s17 = scalar_lea.vmem [#allocation11], %s650_s19 }
  0x98   : > { %vm1328_vm1 = vcmp.ge.s32.totalorder %v258_v4, 1  ;;  %286 = vst [vmem:[#allocation2] sm:$0xf] %v284_v10  ;;  %vm1339_vm4 = vcmp.lt.s32.totalorder %v258_v4, 15  ;;  %s541_s28 = sld [smem:[%s700_s8 + %s1518_s12]]  ;;  %s549_s10 = sshll.u32 %s214_s17, 4  ;;  %s1387_s10 = int_to_ptr.vmem [resolvable:$true] %s549_s10 }
  0x99   : > { %v285_v11 = vsel %vm1328_vm1, %v282_v7, 0.0  ;;  %316 = vrot.lane.b32.xlu1 %v282_v7, %s1024_s15  ;;  %331 = vrot.lane.b32.xlu0 %v282_v7, %s1023_s20  ;;  %s897_s12 = scalar_lea.vmem %s1387_s10, 256 }
  0x9a   : > { %287 = vst [vmem:[#allocation2 + $0x8] sm:$0xf] %v285_v11  ;;  %p898_p2 = scmp.ne.s32.totalorder %s1387_s10, %s897_s12 }
  0x9c   : > { %p899_p13 = pnand %p898_p2, %p1493_p4 }
  0x9d   : > { %314 = vrot.lane.b32.xlu1 %v242_v6, %s1024_s15  ;;  %295 = vrot.lane.b32.xlu0 %v290_v12, %s1025_s13 }
  0x9e   : > { %s656_s2 = sshll.u32 %s541_s28, 8  ;;  %p900_p1 = pneg %p899_p13 }
  0x9f   : > { %s1392_s18 = scalar_lea.hbm %s1454_s4, %s656_s2 }
  0xa1   : > { %365 = vrot.lane.b32.xlu1 %v282_v7, %s1026_s16  ;;  %291 = vrot.lane.b32.xlu0 %v289_v13, %s1025_s13  ;;  %s1033_s13 = smov [#allocation11]  }
  0xa5   : > { %363 = vrot.lane.b32.xlu1 %v242_v6, %s1026_s16  ;;  %367 = vrot.lane.b32.xlu0 %v243_v5, %s1026_s16  ;;  %s901_s16 = sshll.u32 %s1033_s13, 4  ;;  %s902_s16 = int_to_ptr.vmem [resolvable:$false] %s901_s16 }
  0xa6   : > { %p904_p7 = scmp.lt.s32.totalorder %s1387_s10, %s902_s16 }
  0xa9   : > { %388 = vrot.lane.b32.xlu1 %v243_v5, %s1027_s26  ;;  %386 = vrot.lane.b32.xlu0 %v282_v7, %s1027_s26 }
  0xad   : > { %354 = vrot.lane.b32.xlu1 %v243_v5, %s1028_s25  ;;  %352 = vrot.lane.b32.xlu0 %v282_v7, %s1028_s25 }
  0xb1   : > { %401 = vrot.lane.b32.xlu1 %v242_v6, %s1029_s21  ;;  %384 = vrot.lane.b32.xlu0 %v242_v6, %s1027_s26  ;;  %s903_s26 = scalar_lea.vmem %s902_s16, 512 }
  0xb2   : > { %p905_p0 = scmp.lt.s32.totalorder %s903_s26, %s897_s12 }
  0xb4   : > { %p906_p10 = por %p905_p0, %p904_p7 }
  0xb5   : > { %350 = vrot.lane.b32.xlu1 %v242_v6, %s1028_s25  ;;  %403 = vrot.lane.b32.xlu0 %v290_v12, %s1029_s21 }
  0xb6   : > { %p907_p12 = pnand %p906_p10, %p900_p1 }
  0xb9   : > { %414 = vrot.lane.b32.xlu1 %v282_v7, %s1031_s23  ;;  %399 = vrot.lane.b32.xlu0 %v289_v13, %s1029_s21 }
  0xbd   : > { %412 = vrot.lane.b32.xlu1 %v242_v6, %s1031_s23  ;;  %416 = vrot.lane.b32.xlu0 %v243_v5, %s1031_s23 }
 0x103   : > { %v334_v15 = vpop.permute.xlu0 %333  ;;  %v330_v16 = vpop.permute.xlu1 %329 }
 0x107   : > { %v319_v17 = vpop.permute.xlu0 %318  ;;  %v294_v18 = vpop.permute.xlu1 %293 }
 0x10b   : > { %v317_v20 = vpop.permute.xlu1 %316  ;;  %v332_v21 = vpop.permute.xlu0 %331 }
 0x10c   : > { %v322_v22 = vsel %vm320_vm2, %v317_v20, %v319_v17  ;;  %v336_v23 = vsel %vm335_vm3, %v330_v16, %v332_v21  ;;  %v337_v24 = vsel %vm335_vm3, %v332_v21, %v334_v15 }
 0x10d   : > { %v326_v25 = vsel %vm1339_vm4, %v322_v22, 0.0  ;;  %v340_v26 = vsel %vm1324_vm0, %v336_v23, 0.0  ;;  %v341_v27 = vsel %vm1328_vm1, %v337_v24, 0.0 }
 0x10e   : > { %328 = vst [vmem:[#allocation2 + $0x18] sm:$0xf] %v326_v25  ;;  %v344_v28 = vrot.slane %v340_v26, 4  ;;  %v345_v29 = vrot.slane %v341_v27, 4  ;;  %v427_v25 = vld [vmem:[%s189_s22] sm:$0xff]  ;;  %s534_s22 = scalar_lea.sflag [#allocation8], %s212_s5 }
 0x10f   : > { %v315_v31 = vpop.permute.xlu1 %314  ;;  %v296_v32 = vpop.permute.xlu0 %295 }
 0x110   : > { %348 = vst [vmem:[#allocation2 + $0x10] sm:$0xf0] %v344_v28  ;;  %349 = vst [vmem:[#allocation2 + $0x18] sm:$0xf0] %v345_v29  ;;  %v321_v33 = vsel %vm320_vm2, %v315_v31, %v317_v20  ;;  %v299_v34 = vsel %vm297_vm5, %v294_v18, %v296_v32 }
 0x111   : > { %v325_v35 = vsel %vm1352_vm6, %v321_v33, 0.0  ;;  %303 = vst [vmem:[#allocation2 + $0x8] sm:$0xf0] %v299_v34 }
 0x112   : > { %327 = vst [vmem:[#allocation2 + $0x10] sm:$0xf] %v325_v35 }
 0x113   : > { %v366_v36 = vpop.permute.xlu1 %365  ;;  %v292_v37 = vpop.permute.xlu0 %291 }
 0x114   : > { %v298_v38 = vsel %vm297_vm5, %v292_v37, %v294_v18 }
 0x115   : > { %302 = vst [vmem:[#allocation2] sm:$0xf0] %v298_v38 }
 0x117   : > { %v364_v39 = vpop.permute.xlu1 %363  ;;  %v368_v40 = vpop.permute.xlu0 %367  ;;  %v431_v41 = vld [vmem:[#allocation2 + $0x18] sm:$0xff] }
 0x118   : > { %v370_v42 = vsel %vm369_vm7, %v364_v39, %v366_v36  ;;  %v371_v43 = vsel %vm369_vm7, %v366_v36, %v368_v40  ;;  %v429_v44 = vld [vmem:[#allocation2 + $0x8] sm:$0xff] }
 0x119   : > { %v374_v45 = vsel %vm1352_vm6, %v370_v42, 0.0  ;;  %v375_v46 = vsel %vm1339_vm4, %v371_v43, 0.0  ;;  %v657_v47 = vpack.c.bf16 %v431_v41, %v429_v44  ;;  %v430_v54 = vld [vmem:[#allocation2 + $0x10] sm:$0xff] }
 0x11a   : > { %v378_v48 = vrot.slane %v374_v45, 4  ;;  %v379_v49 = vrot.slane %v375_v46, 4 }
 0x11b   : > { %v389_v50 = vpop.permute.xlu1 %388  ;;  %v387_v51 = vpop.permute.xlu0 %386  ;;  %658 = vmatprep.subr.bf16.mxu0 %v657_v47 }
 0x11c   : > { %382 = vst [vmem:[#allocation2 + $0x20] sm:$0xf0] %v378_v48  ;;  %383 = vst [vmem:[#allocation2 + $0x28] sm:$0xf0] %v379_v49  ;;  %v392_v52 = vsel %vm390_vm8, %v387_v51, %v389_v50  ;;  %v428_v53 = vld [vmem:[#allocation2] sm:$0xff] }
 0x11d   : > { %v396_v55 = vsel %vm1328_vm1, %v392_v52, 0.0  ;;  %v659_v56 = vpack.c.bf16 %v430_v54, %v428_v53 }
 0x11e   : > { %398 = vst [vmem:[#allocation2 + $0x38] sm:$0xf] %v396_v55 }
 0x11f   : > { %v355_v57 = vpop.permute.xlu1 %354  ;;  %v353_v58 = vpop.permute.xlu0 %352  ;;  %660 = vmatpush1.bf16.msra.mxu0 %v659_v56 }
 0x120   : > { %v358_v59 = vsel %vm356_vm9, %v353_v58, %v355_v57 }
 0x121   : > { %362 = vst [vmem:[#allocation2 + $0x28] sm:$0xf] %v358_v59 }
 0x123   : > { %v402_v60 = vpop.permute.xlu1 %401  ;;  %v385_v61 = vpop.permute.xlu0 %384 }
 0x124   : > { %v391_v62 = vsel %vm390_vm8, %v385_v61, %v387_v51 }
 0x125   : > { %v395_v63 = vsel %vm1324_vm0, %v391_v62, 0.0 }
 0x126   : > { %397 = vst [vmem:[#allocation2 + $0x30] sm:$0xf] %v395_v63 }
 0x127   : > { %v351_v0 = vpop.permute.xlu1 %350  ;;  %v404_v1 = vpop.permute.xlu0 %403 }
 0x128   : > { %v357_v2 = vsel %vm356_vm9, %v351_v0, %v353_v58  ;;  %v407_v3 = vsel %vm405_vm10, %v402_v60, %v404_v1  ;;  %v433_v8 = vld [vmem:[#allocation2 + $0x28] sm:$0xff] }
 0x129   : > { %361 = vst [vmem:[#allocation2 + $0x20] sm:$0xf] %v357_v2  ;;  %411 = vst [vmem:[#allocation2 + $0x38] sm:$0xf0] %v407_v3 }
 0x12b   : > { %v415_v4 = vpop.permute.xlu1 %414  ;;  %v400_v5 = vpop.permute.xlu0 %399 }
 0x12c   : > { %v406_v6 = vsel %vm405_vm10, %v400_v5, %v402_v60 }
 0x12d   : > { %410 = vst [vmem:[#allocation2 + $0x30] sm:$0xf0] %v406_v6 }
 0x12f   : > { %v413_v7 = vpop.permute.xlu1 %412  ;;  %v417_v9 = vpop.permute.xlu0 %416 }
 0x130   : > { %v419_v10 = vsel %vm418_vm11, %v413_v7, %v415_v4  ;;  %v420_v11 = vsel %vm418_vm11, %v415_v4, %v417_v9  ;;  %v435_v12 = vld [vmem:[#allocation2 + $0x38] sm:$0xff]  ;;  %v432_v17 = vld [vmem:[#allocation2 + $0x20] sm:$0xff] }
 0x131   : > { %v423_v13 = vsel %vm1352_vm6, %v419_v10, 0.0  ;;  %v424_v15 = vsel %vm1339_vm4, %v420_v11, 0.0  ;;  %v661_v16 = vpack.c.bf16 %v435_v12, %v433_v8 }
 0x132   : > { %425 = vst [vmem:[#allocation2 + $0x40] sm:$0xf] %v423_v13  ;;  %426 = vst [vmem:[#allocation2 + $0x48] sm:$0xf] %v424_v15 }
 0x133   : > { %662 = vmatprep.subr.bf16.mxu0 %v661_v16 }
 0x134   : > { %v434_v18 = vld [vmem:[#allocation2 + $0x30] sm:$0xff] }
 0x135   : > { %v663_v20 = vpack.c.bf16 %v434_v18, %v432_v17 }
 0x137   : > { %664 = vmatpush1.bf16.msra.mxu0 %v663_v20 }
 0x139   : > { %v437_v21 = vld [vmem:[#allocation2 + $0x48] sm:$0xff]  ;;  %v436_v22 = vld [vmem:[#allocation2 + $0x40] sm:$0xff] }
 0x13a   : > { %v665_v23 = vpack.c.bf16 %v1030_v14, %v437_v21  ;;  %v667_v24 = vpack.c.bf16 %v1030_v14, %v436_v22 }
 0x13c   : > { %666 = vmatprep.subr.bf16.mxu0 %v665_v23 }
 0x13d   : > { %668 = vmatpush1.bf16.msra.mxu0 %v667_v24 }
 0x13e   : > { %670 = vmatprep.subr.bf16.mxu0 %v1032_v19 }
 0x141   : > { %672 = vmatpush1.bf16.msra.mxu0 %v1032_v19 }
 0x142   : > { %674 = vmatprep.subr.bf16.mxu0 %v1032_v19 }
 0x145   : > { %676 = vmatpush1.bf16.msra.mxu0 %v1032_v19 }
 0x146   : > { %678 = vmatprep.subr.bf16.mxu0 %v1032_v19 }
 0x149   : > { %680 = vmatpush1.bf16.msra.mxu0 %v1032_v19 }
 0x14a   : > { %682 = vmatprep.subr.bf16.mxu0 %v1032_v19 }
 0x14d   : > { %684 = vmatpush1.bf16.msra.mxu0 %v1032_v19 }
 0x14e   : > { %686 = vmatprep.subr.bf16.mxu0 %v1032_v19 }
 0x151   : > { %688 = vmatpush1.bf16.msra.mxu0 %v1032_v19 }
 0x154   : > { %525 = vmatmul.mubr.f32.vlgmr.msra.gmra.mrb[0].mxu0 %v427_v25 }
 0x227   : > { %v526_v14 = vpop.f32.mrb[0].mxu0 }
 0x228   : > { %531 = vst [vmem:[%s214_s17] sm:$0xff] %v526_v14  ;;  %v528_v26 = vpop.f32.mrb[1].mxu0 }
 0x229   : > { %532 = vst [vmem:[%s214_s17 + $0x8] sm:$0xff] %v528_v26 }
 0x22a   : > { %910 = shalt.err (!%p907_p12)
}
 0x22b   : > { %s911_s25 = scalar_lea.hbm %s1392_s18, 256  ;;  %s915_s8 = scalar_lea.hbm %s1454_s4, 512 }
 0x22c   : > { %p912_p11 = scmp.ne.s32.totalorder %s1392_s18, %s911_s25  ;;  %p916_p5 = scmp.lt.u32.totalorder %s1392_s18, %s1454_s4 }
 0x22d   : > { %p917_p9 = scmp.lt.u32.totalorder %s915_s8, %s911_s25  ;;  %p919_p2 = scmp.lt.u32.totalorder %s911_s25, %s1392_s18 }
 0x22e   : > { %p913_p6 = pnand %p912_p11, %p1493_p4 }
 0x22f   : > { %p918_p3 = por %p917_p9, %p916_p5 }
 0x230   : > { %p914_p8 = pneg %p913_p6 }
 0x231   : > { %p920_p13 = por %p919_p2, %p918_p3 }
 0x233   : > { %p921_p1 = pnand %p920_p13, %p914_p8 }
 0x235   : > { %924 = shalt.err (!%p921_p1)
}
 0x236   : > { %702 = dma.vmem_to_hbm [thread:$0]  (%p1493_p4), %s1387_s10, 256, %s1392_s18, %s534_s22  }
 0x237 PF: > { %s561_s19 = sand.u32 1, %s981_s0   ;;  %p1494_p7 = scmp.ne.s32.totalorder %s1469_s27, 0 }
 0x238   : > { %p1495_p0 = scmp.ge.s32.totalorder %s1017_s11, 2  ;;  %s562_s17 = scalar_lea.sflag [#allocation8], %s561_s19 }
 0x23a   : > { %p716_p10 = pnand %p1495_p0, %p1494_p7 }
 0x23c   : > { %976 = dma.done.wait (!%p716_p10), %s562_s17, 256  }
 0x23d   : > { %978 = vsyncadd (!%p716_p10), %s562_s17, 4294967040  ;;  %s1496_s24 = sld [smem:[#allocation23_spill]]  ;;  %s1497_s10 = sld [smem:[#allocation21_spill]] }
 0x23e   : > { %s1498_s2 = sld [smem:[#allocation22_spill]]  ;;  %p28_p4 = scmp.ge.s32.totalorder %s1127_s14, 4  }
 0x23f   : > { %s1499_s0 = smov %s985_s1  ;;  %s1500_s1 = smov %s989_s30 }
 0x240   : > { %s1501_s30 = smov %s1172_s29  ;;  %s1502_s5 = smov %s997_s6 }
 0x241   : > { %s1503_s6 = smov %s1001_s7  ;;  %s1505_s8 = smov %s1009_s9 }
 0x242   : > { %s1508_s11 = smov %s1127_s14  ;;  %30 = sbr.rel (!%p28_p4) target bundleno = 32 (0x20), region = 86 }
 0x243   : > { %s1504_s7 = smov %s1496_s24  ;;  %s1506_s9 = smov %s1497_s10 }
 0x244   : > { %s1507_s10 = smov %s1498_s2 }
 0x249   :  { %567 = vsyncpa [#allocation7], 1 }
 0x24a   :  { %569 = vsyncpa [#allocation7 + $0x1], 1 }
 0x24b   :  { %570 = vsyncpa [#allocation10], 1 }
 0x24c   :  { %572 = vsyncpa [#allocation10 + $0x1], 1 }
 0x24d   :  { %573 = vsyncpa [#allocation8], 1 }
 0x24e   :  { %575 = vsyncpa [#allocation8 + $0x1], 1 }

</bundles_post_ra>
